<compile_context>
chip_gen: v6e
topology: v6e:2x2x1
jax: 0.10.0
libtpu: 0.0.40
codegen_flags: <defaults>
</compile_context>

<pallas_src>
import jax
import jax.numpy as jnp
from jax.experimental import pallas as pl
from jax.experimental.pallas import tpu as pltpu

_LANE = 128                      # minimum lane-dense width
_MAX_LANES = 1024                # preferred lane width of the 2-D view
_TARGET_BLOCK_BYTES = 4 << 20    # ~4 MiB per input block (per perf review)
_BLOCK_VMEM_BUDGET = 24 << 20    # budget for all concurrently-buffered blocks
_VMEM_HEADROOM = 8 << 20


def _choose_lanes(n):
    """Largest multiple of 128 (<=1024) dividing the minimally padded length."""
    pad = (-n) % _LANE           # pad only when n % 128 != 0 (<=127 zeros)
    m = n + pad
    lanes = _LANE
    for cand in range(_MAX_LANES, _LANE - 1, -_LANE):
        if m % cand == 0:
            lanes = cand
            break
    return lanes, pad


def _select_block_rows(rows, lanes, itemsize, concurrent_blocks):
    """Pick a sublane-aligned row-block that fits the VMEM budget."""
    bytes_per_row = lanes * itemsize
    tgt = max(8, _TARGET_BLOCK_BYTES // bytes_per_row)
    cap = max(8, _BLOCK_VMEM_BUDGET // (concurrent_blocks * bytes_per_row))
    block_rows = min(rows, tgt, cap)
    if block_rows < rows:
        block_rows = max(8, (block_rows // 8) * 8)
    elif rows > 64:
        # Give each v7x TensorCore at least one grid step; no-op on v5e/v6e.
        block_rows = ((pl.cdiv(rows, 2) + 7) // 8) * 8
    return block_rows


def _vmem_limit(block_rows, lanes, itemsize, concurrent_blocks):
    usage = concurrent_blocks * block_rows * lanes * itemsize
    return int(min(usage + _VMEM_HEADROOM, 40 << 20))


def _make_partial_sum_kernel(rows, block_rows, need_mask):
    """Per-block partial column-sum of (pred - target)^2 into its own slot."""

    def kernel(p_ref, t_ref, o_ref):
        d = p_ref[...].astype(jnp.float32) - t_ref[...].astype(jnp.float32)
        sq = d * d
        if need_mask:  # static: only compiled when the last block is ragged
            i = pl.program_id(0)
            is_last = i == pl.num_programs(0) - 1

            @pl.when(jnp.logical_not(is_last))
            def _():
                o_ref[...] = jnp.sum(sq, axis=0, keepdims=True)[None]

            @pl.when(is_last)
            def _():
                remaining = rows - i * block_rows
                row_idx = jax.lax.broadcasted_iota(jnp.int32, sq.shape, 0)
                masked = jnp.where(row_idx < remaining, sq, 0.0)
                o_ref[...] = jnp.sum(masked, axis=0, keepdims=True)[None]
        else:
            o_ref[...] = jnp.sum(sq, axis=0, keepdims=True)[None]

    return kernel


def _mse_none_kernel(p_ref, t_ref, o_ref):
    d = p_ref[...].astype(jnp.float32) - t_ref[...].astype(jnp.float32)
    o_ref[...] = (d * d).astype(o_ref.dtype)


def mse_loss(pred, target, reduction="mean"):
    """JAX/Pallas equivalent of torch.nn.MSELoss(reduction=...)."""
    if pred.shape != target.shape:
        raise ValueError("pred and target must have the same shape")
    if reduction not in ("mean", "sum", "none"):
        raise ValueError(f"unsupported reduction: {reduction}")

    n = pred.size
    lanes, pad = _choose_lanes(n)
    p_flat = pred.reshape(-1)
    t_flat = target.reshape(-1)
    if pad:  # rare path: n % 128 != 0; adds <=127 zeros to each operand
        p_flat = jnp.pad(p_flat, (0, pad))
        t_flat = jnp.pad(t_flat, (0, pad))
    rows = (n + pad) // lanes
    p2 = p_flat.reshape(rows, lanes)
    t2 = t_flat.reshape(rows, lanes)

    itemsize = p2.dtype.itemsize
    in_bytes = 2 * rows * lanes * itemsize

    if reduction == "none":
        # 2 inputs + 1 output, double-buffered -> 6 concurrent blocks.
        block_rows = _select_block_rows(rows, lanes, itemsize, concurrent_blocks=6)
        grid = pl.cdiv(rows, block_rows)
        out2 = pl.pallas_call(
            _mse_none_kernel,
            out_shape=jax.ShapeDtypeStruct((rows, lanes), pred.dtype),
            grid_spec=pltpu.PrefetchScalarGridSpec(
                num_scalar_prefetch=0,
                grid=(grid,),
                in_specs=[pl.BlockSpec((block_rows, lanes), lambda i: (i, 0)),
                          pl.BlockSpec((block_rows, lanes), lambda i: (i, 0))],
                out_specs=pl.BlockSpec((block_rows, lanes), lambda i: (i, 0)),
            ),
            compiler_params=pltpu.CompilerParams(
                dimension_semantics=("parallel",),
                vmem_limit_bytes=_vmem_limit(block_rows, lanes, itemsize, 6)),
            cost_estimate=pl.CostEstimate(
                flops=2 * rows * lanes,
                transcendentals=0,
                bytes_accessed=in_bytes + rows * lanes * itemsize),
        )(p2, t2)
        out_flat = out2.reshape(-1)
        if pad:
            out_flat = out_flat[:n]
        return out_flat.reshape(pred.shape)

    # "mean" / "sum": per-block partial sums, parallel grid, final reduce in JAX.
    # 2 inputs double-buffered -> 4 concurrent blocks (outputs are tiny).
    block_rows = _select_block_rows(rows, lanes, itemsize, concurrent_blocks=4)
    grid = pl.cdiv(rows, block_rows)
    need_mask = (rows % block_rows) != 0
    kernel = _make_partial_sum_kernel(rows, block_rows, need_mask)
    # Note: default double-buffering is kept; pl.Buffered(3) on the inputs is a
    # possible v6e/v7x tweak if a trace ever shows exposed DMA at stream edges.
    partials = pl.pallas_call(
        kernel,
        out_shape=jax.ShapeDtypeStruct((grid, 1, lanes), jnp.float32),
        grid_spec=pltpu.PrefetchScalarGridSpec(
            num_scalar_prefetch=0,
            grid=(grid,),
            in_specs=[pl.BlockSpec((block_rows, lanes), lambda i: (i, 0)),
                      pl.BlockSpec((block_rows, lanes), lambda i: (i, 0))],
            out_specs=pl.BlockSpec((1, 1, lanes), lambda i: (i, 0, 0)),
        ),
        compiler_params=pltpu.CompilerParams(
            dimension_semantics=("parallel",),
            vmem_limit_bytes=_vmem_limit(block_rows, lanes, itemsize, 4)),
        cost_estimate=pl.CostEstimate(
            flops=3 * rows * lanes,
            transcendentals=0,
            bytes_accessed=in_bytes + grid * lanes * 4),
    )(p2, t2)

    total = jnp.sum(partials, dtype=jnp.float32)
    if reduction == "mean":
        total = total / n
    return total.astype(pred.dtype)


if __name__ == "__main__":
    key = jax.random.PRNGKey(0)
    k1, k2 = jax.random.split(key)

    # NCHW-like small shape consistent with a typical use of this loss module.
    pred = jax.random.normal(k1, (2, 4, 16, 16), dtype=jnp.float32)
    target = jax.random.normal(k2, (2, 4, 16, 16), dtype=jnp.float32)

    loss = mse_loss(pred, target, reduction="mean")
    jax.block_until_ready(loss)
    ref = jnp.mean((pred - target) ** 2)
    assert jnp.allclose(loss, ref, rtol=1e-5, atol=1e-5), (loss, ref)

    loss_sum = mse_loss(pred, target, reduction="sum")
    jax.block_until_ready(loss_sum)
    ref_sum = jnp.sum((pred - target) ** 2)
    assert jnp.allclose(loss_sum, ref_sum, rtol=1e-4, atol=1e-4), (loss_sum, ref_sum)

    loss_none = mse_loss(pred, target, reduction="none")
    jax.block_until_ready(loss_none)
    assert jnp.allclose(loss_none, (pred - target) ** 2, rtol=1e-5, atol=1e-5)

    # Odd element count -> minimal (<128-element) zero-padding fallback path.
    p_odd = jax.random.normal(k1, (3, 5, 7), dtype=jnp.float32)
    t_odd = jax.random.normal(k2, (3, 5, 7), dtype=jnp.float32)
    loss_odd = mse_loss(p_odd, t_odd, reduction="mean")
    jax.block_until_ready(loss_odd)
    assert jnp.allclose(loss_odd, jnp.mean((p_odd - t_odd) ** 2),
                        rtol=1e-5, atol=1e-5)

    # Mid-size -> grid of 2 (megacore split) with a gated ragged last block.
    p_mid = jax.random.normal(k1, (8, 16, 24, 24), dtype=jnp.float32)
    t_mid = jax.random.normal(k2, (8, 16, 24, 24), dtype=jnp.float32)
    loss_mid = mse_loss(p_mid, t_mid, reduction="sum")
    jax.block_until_ready(loss_mid)
    ref_mid = jnp.sum((p_mid - t_mid) ** 2)
    assert jnp.allclose(loss_mid, ref_mid, rtol=1e-4, atol=1e-4), (loss_mid, ref_mid)
    none_mid = mse_loss(p_mid, t_mid, reduction="none")
    jax.block_until_ready(none_mid)
    assert jnp.allclose(none_mid, (p_mid - t_mid) ** 2, rtol=1e-5, atol=1e-5)

    print("KERNEL_OK")
</pallas_src>

<mosaic_0001>
module attributes {stable_mosaic.version = 11 : i64} {
  func.func @kernel(%arg0: i32, %arg1: memref<2x1024xf32, #tpu.memory_space<vmem>>, %arg2: memref<2x1024xf32, #tpu.memory_space<vmem>>, %arg3: memref<1x1x1024xf32, #tpu.memory_space<vmem>>) attributes {dimension_semantics = [#tpu.dimension_semantics<parallel>], iteration_bounds = array<i64: 1>, scalar_prefetch = 0 : i64, scratch_operands = 0 : i64, tpu.core_type = #tpu.core_type<tc>, window_params = [{transform_indices = @transform_0, window_bounds = array<i64: 2, 1024>}, {transform_indices = @transform_1, window_bounds = array<i64: 2, 1024>}, {transform_indices = @transform_2, window_bounds = array<i64: 1, 1, 1024>}]} {
    %c0 = arith.constant 0 : index
    %c0_0 = arith.constant 0 : index
    %0 = vector.load %arg1[%c0, %c0_0] : memref<2x1024xf32, #tpu.memory_space<vmem>>, vector<2x1024xf32>
    %c0_1 = arith.constant 0 : index
    %c0_2 = arith.constant 0 : index
    %1 = vector.load %arg2[%c0_1, %c0_2] : memref<2x1024xf32, #tpu.memory_space<vmem>>, vector<2x1024xf32>
    %2 = arith.subf %0, %1 : vector<2x1024xf32>
    %3 = arith.mulf %2, %2 : vector<2x1024xf32>
    %cst = arith.constant dense<0.000000e+00> : vector<1024xf32>
    %4 = vector.multi_reduction <add>, %3, %cst [0] : vector<2x1024xf32> to vector<1024xf32>
    %5 = vector.shape_cast %4 : vector<1024xf32> to vector<1x1024xf32>
    %6 = vector.shape_cast %5 : vector<1x1024xf32> to vector<1x1x1024xf32>
    %c0_3 = arith.constant 0 : index
    %c0_4 = arith.constant 0 : index
    %c0_5 = arith.constant 0 : index
    %7 = vector.load %arg3[%c0_3, %c0_4, %c0_5] : memref<1x1x1024xf32, #tpu.memory_space<vmem>>, vector<1x1x1024xf32>
    tpu.vector_store %arg3[%c0_3, %c0_4, %c0_5], %6 {strides = array<i32>} : memref<1x1x1024xf32, #tpu.memory_space<vmem>>, vector<1x1x1024xf32>,
    return
  }
  func.func @transform_0(%arg0: i32) -> (i32, i32) {
    %c0_i32 = arith.constant 0 : i32
    %c0_i32_0 = arith.constant 0 : i32
    return %arg0, %c0_i32 : i32, i32
  }
  func.func @transform_1(%arg0: i32) -> (i32, i32) {
    %c0_i32 = arith.constant 0 : i32
    %c0_i32_0 = arith.constant 0 : i32
    return %arg0, %c0_i32 : i32, i32
  }
  func.func @transform_2(%arg0: i32) -> (i32, i32, i32) {
    %c0_i32 = arith.constant 0 : i32
    %c0_i32_0 = arith.constant 0 : i32
    %c0_i32_1 = arith.constant 0 : i32
    return %arg0, %c0_i32, %c0_i32_0 : i32, i32, i32
  }
}

</mosaic_0001>

<bundles_post_ra>
// kernel: tpu_custom_call.1
= control target key start
LH: loop header
LB: loop body
LE: loop exit
PB: predicated region body
PF: predicated region fallthrough
CT: control target
= control target key end

     0   :  { %7 = vsyncpa [#allocation3], 0  ;;  %s332_s0 = inlined_call_operand.hbm [shape: f32[2,1024], index: 0, kind: input, shape index: {}]   ;;  %s333_s1 = inlined_call_operand.hbm [shape: f32[2,1024], index: 1, kind: input, shape index: {}]   ;;  %s334_s2 = inlined_call_operand.hbm [shape: f32[1,1,1024], index: 2, kind: output, shape index: {}]  }
   0x1   :  { %8 = vsyncpa [#allocation6], 0 }
   0x2   :  { %9 = vsyncpa [#allocation4], 0  ;;  %s291_s9 = smov [#allocation2]   ;;  %s292_s11 = smov [#allocation5]  }
   0x3   :  { %s16_s10 = sshll.u32 %s291_s9, 4  ;;  %s26_s12 = sshll.u32 %s292_s11, 4  ;;  %s17_s10 = int_to_ptr.vmem [resolvable:$true] %s16_s10  ;;  %s27_s12 = int_to_ptr.vmem [resolvable:$true] %s26_s12 }
   0x4   :  { %s233_s13 = scalar_lea.vmem %s17_s10, 256  ;;  %p238_p1 = scmp.lt.s32.totalorder %s17_s10, %s17_s10 }
   0x5   :  { %p234_p0 = scmp.ne.s32.totalorder %s17_s10, %s233_s13  ;;  %p239_p2 = scmp.lt.s32.totalorder %s233_s13, %s233_s13 }
   0x7   :  { %p240_p3 = por %p239_p2, %p238_p1 }
   0x9   :  { %p241_p4 = pnand %p240_p3, %p234_p0 }
   0xb   :  { %244 = shalt.err (!%p241_p4)
}
   0xc   :  { %19 = dma.hbm_to_vmem [thread:$0]  %s332_s0, 256, %s17_s10, [#allocation3]  }
   0xd   :  { %s253_s16 = scalar_lea.vmem %s27_s12, 256  ;;  %p258_p6 = scmp.lt.s32.totalorder %s27_s12, %s27_s12 }
   0xe   :  { %p254_p5 = scmp.ne.s32.totalorder %s27_s12, %s253_s16  ;;  %p259_p7 = scmp.lt.s32.totalorder %s253_s16, %s253_s16 }
  0x10   :  { %p260_p8 = por %p259_p7, %p258_p6 }
  0x12   :  { %p261_p9 = pnand %p260_p8, %p254_p5 }
  0x14   :  { %264 = shalt.err (!%p261_p9)
}
  0x15   :  { %29 = dma.hbm_to_vmem [thread:$0]  %s333_s1, 256, %s27_s12, [#allocation6]  }
  0x16   :  { %285 = dma.done.wait [#allocation3], 256  }
  0x17   :  { %286 = vsyncadd [#allocation3], 4294967040 }
  0x18   :  { %287 = dma.done.wait [#allocation6], 256  }
  0x19   :  { %288 = vsyncadd [#allocation6], 4294967040  ;;  %v50_v0 = vlaneseq  ;;  %v293_v1 = vmov 1983009808   ;;  %v36_v5 = vld [vmem:[#allocation2] sm:$0xff]  ;;  %v37_v6 = vld [vmem:[#allocation2 + $0x8] sm:$0xff] }
  0x1a   :  { %v48_v2 = vunpack.c.l.s4 %v293_v1  ;;  %v38_v7 = vld [vmem:[#allocation5] sm:$0xff]  ;;  %v39_v8 = vld [vmem:[#allocation5 + $0x8] sm:$0xff]  ;;  %v294_v13 = vmov 1966171168   ;;  %vm88_vm0 = vcmask 1041408   ;;  %s295_s0 = smov [#allocation7]  }
  0x1b   :  { %v317_v4 = vshrl.u32 %v50_v0, 7  ;;  %v40_v9 = vsub.f32 %v36_v5, %v38_v7  ;;  %v41_v11 = vsub.f32 %v37_v6, %v39_v8  ;;  %v158_v14 = vunpack.c.l.s4 %v294_v13  ;;  %s210_s1 = sshll.u32 %s295_s0, 4  ;;  %s211_s1 = int_to_ptr.vmem [resolvable:$true] %s210_s1 }
  0x1c   :  { %v49_v3 = vunpack.c.0.s8 %v48_v2  ;;  %s265_s19 = scalar_lea.vmem %s211_s1, 128  ;;  %p270_p11 = scmp.lt.s32.totalorder %s211_s1, %s211_s1 }
  0x1d   :  { %v42_v12 = vmul.f32 %v40_v9, %v40_v9  ;;  %v43_v15 = vmul.f32 %v41_v11, %v41_v11  ;;  %v159_v23 = vunpack.c.0.s8 %v158_v14  ;;  %p266_p10 = scmp.ne.s32.totalorder %s211_s1, %s265_s19  ;;  %p271_p12 = scmp.lt.s32.totalorder %s265_s19, %s265_s19 }
  0x1e   :  { %v52_v10 = vsub.s32 %v49_v3, %v317_v4 }
  0x1f   :  { %v46_v16 = vcombine.high %v42_v12, %v42_v12  ;;  %v63_v18 = vcombine.high %v43_v15, %v43_v15  ;;  %v162_v11 = vsub.s32 %v159_v23, %v317_v4  ;;  %p272_p13 = por %p271_p12, %p270_p11 }
  0x20   :  { %v53_v17 = vrot.slane %v42_v12, %v52_v10  ;;  %v70_v19 = vrot.slane %v43_v15, %v52_v10 }
  0x21   :  { %v60_v20 = vrot.slane %v46_v16, %v52_v10  ;;  %v77_v24 = vrot.slane %v63_v18, %v52_v10  ;;  %p273_p0 = pnand %p272_p13, %p266_p10 }
  0x22   :  { %v61_v21 = vcombine.high %v53_v17, %v53_v17  ;;  %v89_v22 = vsel %vm88_vm0, %v53_v17, 0.0  ;;  %v78_v25 = vcombine.high %v70_v19, %v70_v19  ;;  %v117_v27 = vsel %vm88_vm0, %v70_v19, 0.0 }
  0x23   :  { %v90_v26 = vrot.slane %v89_v22, 4  ;;  %v62_v28 = vcombine.high %v60_v20, %v60_v20  ;;  %v103_v30 = vsel %vm88_vm0, %v60_v20, 0.0  ;;  %v118_v31 = vrot.slane %v117_v27, 4 }
  0x24   :  { %v96_v29 = vsel %vm88_vm0, %v61_v21, 0.0  ;;  %v79_v32 = vcombine.high %v77_v24, %v77_v24  ;;  %v104_v35 = vrot.slane %v103_v30, 4  ;;  %v124_v38 = vsel %vm88_vm0, %v78_v25, 0.0 }
  0x25   :  { %v91_v33 = vadd.f32 %v90_v26, %v89_v22  ;;  %v97_v34 = vrot.slane %v96_v29, 4  ;;  %v110_v36 = vsel %vm88_vm0, %v62_v28, 0.0  ;;  %v119_v37 = vadd.f32 %v118_v31, %v117_v27 }
  0x26   :  { %v131_v39 = vsel %vm88_vm0, %v77_v24, 0.0  ;;  %v105_v42 = vadd.f32 %v104_v35, %v103_v30  ;;  %v111_v43 = vrot.slane %v110_v36, 4  ;;  %v125_v45 = vrot.slane %v124_v38, 4 }
  0x27   :  { %v92_v40 = vrot.slane %v91_v33, 2  ;;  %v98_v41 = vadd.f32 %v97_v34, %v96_v29  ;;  %v120_v44 = vrot.slane %v119_v37, 2  ;;  %v132_v46 = vrot.slane %v131_v39, 4 }
  0x28   :  { %v138_v47 = vsel %vm88_vm0, %v79_v32, 0.0  ;;  %v106_v50 = vrot.slane %v105_v42, 2  ;;  %v112_v51 = vadd.f32 %v111_v43, %v110_v36  ;;  %v126_v53 = vadd.f32 %v125_v45, %v124_v38 }
  0x29   :  { %v93_v48 = vadd.f32 %v92_v40, %v91_v33  ;;  %v99_v49 = vrot.slane %v98_v41, 2  ;;  %v121_v52 = vadd.f32 %v120_v44, %v119_v37  ;;  %v133_v54 = vadd.f32 %v132_v46, %v131_v39 }
  0x2a   :  { %v139_v55 = vrot.slane %v138_v47, 4  ;;  %v107_v58 = vadd.f32 %v106_v50, %v105_v42  ;;  %v113_v59 = vrot.slane %v112_v51, 2  ;;  %v127_v61 = vrot.slane %v126_v53, 2 }
  0x2b   :  { %v94_v56 = vrot.slane %v93_v48, 1  ;;  %v100_v57 = vadd.f32 %v99_v49, %v98_v41  ;;  %v122_v60 = vrot.slane %v121_v52, 1  ;;  %v134_v62 = vrot.slane %v133_v54, 2 }
  0x2c   :  { %v140_v63 = vadd.f32 %v139_v55, %v138_v47  ;;  %v108_v2 = vrot.slane %v107_v58, 1  ;;  %v114_v3 = vadd.f32 %v113_v59, %v112_v51  ;;  %v128_v5 = vadd.f32 %v127_v61, %v126_v53 }
  0x2d   :  { %v95_v0 = vadd.f32 %v94_v56, %v93_v48  ;;  %v101_v1 = vrot.slane %v100_v57, 1  ;;  %v135_v6 = vadd.f32 %v134_v62, %v133_v54  ;;  %v123_v12 = vadd.f32 %v122_v60, %v121_v52 }
  0x2e   :  { %v141_v7 = vrot.slane %v140_v63, 2  ;;  %v109_v9 = vadd.f32 %v108_v2, %v107_v58  ;;  %v115_v10 = vrot.slane %v114_v3, 1  ;;  %v129_v13 = vrot.slane %v128_v5, 1 }
  0x2f   :  { %v102_v8 = vadd.f32 %v101_v1, %v100_v57  ;;  %v136_v14 = vrot.slane %v135_v6, 1 }
  0x30   :  { %v142_v15 = vadd.f32 %v141_v7, %v140_v63  ;;  %v116_v16 = vadd.f32 %v115_v10, %v114_v3  ;;  %v130_v18 = vadd.f32 %v129_v13, %v128_v5 }
  0x31   :  { %v153_v17 = vcombine.low %v95_v0, %v102_v8  ;;  %v137_v19 = vadd.f32 %v136_v14, %v135_v6 }
  0x32   :  { %v143_v20 = vrot.slane %v142_v15, 1  ;;  %v154_v21 = vcombine.low %v109_v9, %v116_v16  ;;  %v155_v25 = vcombine.low %v123_v12, %v130_v18 }
  0x33   :  { %v163_v22 = vrot.slane %v153_v17, %v162_v11 }
  0x34   :  { %v144_v24 = vadd.f32 %v143_v20, %v142_v15  ;;  %v170_v26 = vrot.slane %v154_v21, %v162_v11  ;;  %v177_v28 = vrot.slane %v155_v25, %v162_v11 }
  0x36   :  { %v156_v27 = vcombine.low %v137_v19, %v144_v24  ;;  %v185_v29 = vcombine.low %v163_v22, %v170_v26 }
  0x38   :  { %v184_v30 = vrot.slane %v156_v27, %v162_v11  ;;  %v193_v4 = vrot.slane %v185_v29, %v162_v11 }
  0x3a   :  { %v186_v31 = vcombine.low %v177_v28, %v184_v30 }
  0x3c   :  { %v200_v23 = vrot.slane %v186_v31, %v162_v11 }
  0x3e   :  { %v201_v32 = vcombine.low %v193_v4, %v200_v23 }
  0x40   :  { %203 = vst [vmem:[#allocation7] sm:$0xff] %v201_v32 }
  0x41   :  { %276 = shalt.err (!%p273_p0)
}
  0x42   :  { %213 = dma.vmem_to_hbm [thread:$0]  %s211_s1, 128, %s334_s2, [#allocation4]  }
  0x43   :  { %289 = dma.done.wait [#allocation4], 128  }
  0x44   :  { %290 = vsyncadd [#allocation4], 4294967168 }
  0x45   :  { %217 = vsyncpa [#allocation3], 1 }
  0x46   :  { %218 = vsyncpa [#allocation6], 1 }
  0x47   :  { %219 = vsyncpa [#allocation4], 1 }

</bundles_post_ra>
